<compile_context>
chip_gen: v5e
topology: v5e:2x2
jax: 0.10.0
libtpu: 0.0.40
codegen_flags: <defaults>
</compile_context>

<pallas_src>
import functools

import jax
import jax.numpy as jnp
from jax.experimental import pallas as pl
from jax.experimental.pallas import tpu as pltpu


def _round_up(v, m):
    return ((v + m - 1) // m) * m


def _ceil_div(a, b):
    return -(-a // b)


def _largest_divisor_leq(q, cap):
    """Largest divisor of q that is <= cap (q, cap >= 1)."""
    cap = max(1, min(q, cap))
    for d in range(cap, 0, -1):
        if q % d == 0:
            return d
    return 1


# ----------------------------- kernels -------------------------------------


def _linear1d_kernel(x_ref, w_ref, o_ref, *, scale):
    # Full-K block: one MXU matmul, scale, single lane-dense store.
    acc = jnp.dot(x_ref[...], w_ref[...], preferred_element_type=jnp.float32)
    o_ref[...] = (acc * scale).astype(o_ref.dtype)


def _linear1d_bias_kernel(x_ref, w_ref, b_ref, o_ref, *, scale):
    acc = jnp.dot(x_ref[...], w_ref[...], preferred_element_type=jnp.float32)
    acc = acc * scale + 0.1 * b_ref[...].astype(jnp.float32)
    o_ref[...] = acc.astype(o_ref.dtype)


def _linear1d_ksplit_kernel(x_ref, w_ref, o_ref, *, scale):
    # K-reduction hot loop: accumulate directly into the resident f32 output
    # block (no scratch); scale only in the finalize branch.
    k = pl.program_id(2)
    p = jnp.dot(x_ref[...], w_ref[...], preferred_element_type=jnp.float32)

    @pl.when(k == 0)
    def _():
        o_ref[...] = p

    @pl.when(k != 0)
    def _():
        o_ref[...] += p

    @pl.when(k == pl.num_programs(2) - 1)
    def _():
        o_ref[...] = o_ref[...] * scale


def _linear1d_ksplit_bias_kernel(x_ref, w_ref, b_ref, o_ref, *, scale):
    k = pl.program_id(2)
    p = jnp.dot(x_ref[...], w_ref[...], preferred_element_type=jnp.float32)

    @pl.when(k == 0)
    def _():
        o_ref[...] = p

    @pl.when(k != 0)
    def _():
        o_ref[...] += p

    @pl.when(k == pl.num_programs(2) - 1)
    def _():
        o_ref[...] = o_ref[...] * scale + 0.1 * b_ref[...].astype(jnp.float32)


# ----------------------------- wrapper --------------------------------------


def prepare_linear1d_params(weight, bias=None):
    """One-time parameter preparation (do this at init, reuse every forward).

    weight: (C_out, C_in) PyTorch layout; bias: (1, C_out) or None.
    Returns a dict with the pre-transposed, lane-padded weight (C_in_pad,
    C_out_pad), padded bias, and the original channel counts.
    """
    C_out, C_in = weight.shape
    Kp = _round_up(C_in, 128)
    Np = _round_up(C_out, 128)
    w_t = weight.T  # (C_in, C_out): MXU-friendly, no in-kernel transpose
    if (Kp, Np) != (C_in, C_out):
        w_t = jnp.pad(w_t, ((0, Kp - C_in), (0, Np - C_out)))
    b_p = None
    if bias is not None:
        b_p = bias if Np == C_out else jnp.pad(bias, ((0, 0), (0, Np - C_out)))
    return {"w": w_t, "b": b_p, "c_in": C_in, "c_out": C_out}


def linear1d_apply(params, x, *, tm_target=256, tn_target=512, tk_target=1024,
                   k_fuse_limit=4096):
    """Forward pass using prepared params.  x: (B, C_in) -> (B, C_out)."""
    w_p, b_p = params["w"], params["b"]
    C_in, C_out = params["c_in"], params["c_out"]
    B, xc = x.shape
    assert xc == C_in
    Kp, Np = w_p.shape
    scale = 1.0 / (C_in ** 0.5)  # original C_in, not padded

    # --- M tiles: balanced split of the 8-rounded batch (padding < 1 tile). --
    Mp0 = _round_up(B, 8)
    nb_m = max(1, _ceil_div(Mp0, tm_target))
    tm = _round_up(_ceil_div(Mp0, nb_m), 8)
    Mp = tm * nb_m

    # --- N tiles: 128-multiple that exactly divides the pre-padded Np. ------
    q_n = Np // 128
    cap_n = max(1, tn_target // 128)
    if nb_m == 1 and q_n >= 2:
        # Guarantee >=2 parallel blocks so both v7x TensorCores get work.
        cap_n = max(1, min(cap_n, q_n // 2))
    d_n = _largest_divisor_leq(q_n, cap_n)
    tn = 128 * d_n
    nb_n = q_n // d_n

    # --- Pad x only (cheap; weight/bias were padded once at prepare time). --
    if (Mp, Kp) != (B, C_in):
        x_p = jnp.pad(x, ((0, Mp - B), (0, Kp - C_in)))
    else:
        x_p = x

    cost = pl.CostEstimate(
        flops=2 * B * C_in * C_out,
        transcendentals=0,
        bytes_accessed=(x.size + w_p.size + B * C_out) * x.dtype.itemsize,
    )

    if Kp <= k_fuse_limit:
        # Fast path: whole K in one block; 2D grid, no accumulator, no pl.when.
        grid = (nb_m, nb_n)
        x_spec = pl.BlockSpec((tm, Kp), lambda i, j: (i, 0))
        w_spec = pl.BlockSpec((Kp, tn), lambda i, j: (0, j))
        o_spec = pl.BlockSpec((tm, tn), lambda i, j: (i, j))
        out_shape = jax.ShapeDtypeStruct((Mp, Np), x.dtype)
        sems = ("parallel", "parallel")
        if b_p is None:
            kern = functools.partial(_linear1d_kernel, scale=scale)
            in_specs = [x_spec, w_spec]
            args = (x_p, w_p)
        else:
            kern = functools.partial(_linear1d_bias_kernel, scale=scale)
            in_specs = [x_spec, w_spec, pl.BlockSpec((1, tn), lambda i, j: (0, j))]
            args = (x_p, w_p, b_p)
    else:
        # Large-K path: 3D grid, reduction axis last, accumulate into o_ref.
        q_k = Kp // 128
        d_k = _largest_divisor_leq(q_k, max(1, tk_target // 128))
        tk = 128 * d_k
        nb_k = q_k // d_k
        grid = (nb_m, nb_n, nb_k)
        x_spec = pl.BlockSpec((tm, tk), lambda i, j, k: (i, k))
        w_spec = pl.BlockSpec((tk, tn), lambda i, j, k: (k, j))
        o_spec = pl.BlockSpec((tm, tn), lambda i, j, k: (i, j))
        out_shape = jax.ShapeDtypeStruct((Mp, Np), jnp.float32)
        sems = ("parallel", "parallel", "arbitrary")
        if b_p is None:
            kern = functools.partial(_linear1d_ksplit_kernel, scale=scale)
            in_specs = [x_spec, w_spec]
            args = (x_p, w_p)
        else:
            kern = functools.partial(_linear1d_ksplit_bias_kernel, scale=scale)
            in_specs = [x_spec, w_spec,
                        pl.BlockSpec((1, tn), lambda i, j, k: (0, j))]
            args = (x_p, w_p, b_p)

    out = pl.pallas_call(
        kern,
        out_shape=out_shape,
        grid=grid,
        in_specs=in_specs,
        out_specs=o_spec,
        compiler_params=pltpu.CompilerParams(
            dimension_semantics=sems,
            vmem_limit_bytes=48 * 1024 * 1024,
        ),
        cost_estimate=cost,
    )(*args)

    out = out[:B, :C_out]
    if out.dtype != x.dtype:
        out = out.astype(x.dtype)
    return out


def linear1d(x, weight, bias=None, **kwargs):
    """Convenience one-shot entry point (prepares params on every call).
    For repeated forwards, call prepare_linear1d_params once and reuse it."""
    return linear1d_apply(prepare_linear1d_params(weight, bias), x, **kwargs)


def linear1d_ref(x, weight, bias=None):
    """Pure-JAX reference mirroring the PyTorch forward exactly."""
    y = (x[:, None, :] * weight[None, :, :]).sum(axis=-1)
    y = y / (x.shape[-1] ** 0.5)
    if bias is not None:
        y = y + bias * 0.1
    return y


if __name__ == "__main__":
    key = jax.random.PRNGKey(0)
    k_x, k_w, k_b, k_x2, k_w2 = jax.random.split(key, 5)

    batch = 8
    input_channels = 32
    out_channels = 64

    x = jax.random.normal(k_x, (batch, input_channels), dtype=jnp.float32)
    weight = jax.random.normal(k_w, (out_channels, input_channels), dtype=jnp.float32)
    bias = jax.random.normal(k_b, (1, out_channels), dtype=jnp.float32)

    # No-bias path (module default: bias=False), prepared params reused.
    params = prepare_linear1d_params(weight)
    y = jax.block_until_ready(linear1d_apply(params, x))
    y_ref = linear1d_ref(x, weight)
    assert jnp.allclose(y, y_ref, atol=1e-5, rtol=1e-5), "no-bias mismatch"

    # Bias path (bias=True).
    params_b = prepare_linear1d_params(weight, bias)
    yb = jax.block_until_ready(linear1d_apply(params_b, x))
    yb_ref = linear1d_ref(x, weight, bias)
    assert jnp.allclose(yb, yb_ref, atol=1e-5, rtol=1e-5), "bias mismatch"

    # Exercise the K-split (3D grid) path with small shapes by forcing a split.
    x2 = jax.random.normal(k_x2, (16, 256), dtype=jnp.float32)
    w2 = jax.random.normal(k_w2, (384, 256), dtype=jnp.float32)
    y2 = jax.block_until_ready(linear1d(x2, w2, k_fuse_limit=0, tk_target=128))
    y2_ref = linear1d_ref(x2, w2)
    assert jnp.allclose(y2, y2_ref, atol=1e-4, rtol=1e-4), "k-split mismatch"

    print("KERNEL_OK")
</pallas_src>

<mosaic_0001>
module attributes {stable_mosaic.version = 11 : i64} {
  func.func @_linear1d_kernel(%arg0: i32, %arg1: i32, %arg2: memref<8x128xf32, #tpu.memory_space<vmem>>, %arg3: memref<128x128xf32, #tpu.memory_space<vmem>>, %arg4: memref<8x128xf32, #tpu.memory_space<vmem>>) attributes {dimension_semantics = [#tpu.dimension_semantics<parallel>, #tpu.dimension_semantics<parallel>], iteration_bounds = array<i64: 1, 1>, scalar_prefetch = 0 : i64, scratch_operands = 0 : i64, tpu.core_type = #tpu.core_type<tc>, window_params = [{transform_indices = @transform_0, window_bounds = array<i64: 8, 128>}, {transform_indices = @transform_1, window_bounds = array<i64: 128, 128>}, {transform_indices = @transform_2, window_bounds = array<i64: 8, 128>}]} {
    %c0 = arith.constant 0 : index
    %c0_0 = arith.constant 0 : index
    %0 = vector.load %arg2[%c0, %c0_0] : memref<8x128xf32, #tpu.memory_space<vmem>>, vector<8x128xf32>
    %c0_1 = arith.constant 0 : index
    %c0_2 = arith.constant 0 : index
    %1 = vector.load %arg3[%c0_1, %c0_2] : memref<128x128xf32, #tpu.memory_space<vmem>>, vector<128x128xf32>
    %cst = arith.constant dense<0.000000e+00> : vector<8x128xf32>
    %2 = tpu.matmul %0, %1, %cst {dimension_numbers = #tpu.dot_dimension_numbers<[1], [0], [0], [1], [0, 0, 1, 1], [], []>} : vector<8x128xf32>, vector<128x128xf32>, vector<8x128xf32> -> vector<8x128xf32>
    %cst_3 = arith.constant 0.176776692 : f32
    %3 = vector.broadcast %cst_3 : f32 to vector<8x128xf32>
    %4 = arith.mulf %2, %3 : vector<8x128xf32>
    %c0_4 = arith.constant 0 : index
    %c0_5 = arith.constant 0 : index
    %5 = vector.load %arg4[%c0_4, %c0_5] : memref<8x128xf32, #tpu.memory_space<vmem>>, vector<8x128xf32>
    tpu.vector_store %arg4[%c0_4, %c0_5], %4 {strides = array<i32>} : memref<8x128xf32, #tpu.memory_space<vmem>>, vector<8x128xf32>,
    return
  }
  func.func @transform_0(%arg0: i32, %arg1: i32) -> (i32, i32) {
    %c0_i32 = arith.constant 0 : i32
    %c0_i32_0 = arith.constant 0 : i32
    return %arg0, %c0_i32 : i32, i32
  }
  func.func @transform_1(%arg0: i32, %arg1: i32) -> (i32, i32) {
    %c0_i32 = arith.constant 0 : i32
    %c0_i32_0 = arith.constant 0 : i32
    return %c0_i32, %arg1 : i32, i32
  }
  func.func @transform_2(%arg0: i32, %arg1: i32) -> (i32, i32) {
    %c0_i32 = arith.constant 0 : i32
    return %arg0, %arg1 : i32, i32
  }
}

</mosaic_0001>

<bundles_post_ra>
// kernel: tpu_custom_call.1
= control target key start
LH: loop header
LB: loop body
LE: loop exit
PB: predicated region body
PF: predicated region fallthrough
CT: control target
= control target key end

     0   :  { %7 = vsyncpa [#allocation3], 0  ;;  %s211_s0 = inlined_call_operand.hbm [shape: f32[8,128], index: 0, kind: input, shape index: {}]   ;;  %s212_s1 = inlined_call_operand.hbm [shape: f32[128,128], index: 1, kind: input, shape index: {}]   ;;  %s213_s2 = inlined_call_operand.hbm [shape: f32[8,128], index: 2, kind: output, shape index: {}]  }
   0x1   :  { %8 = vsyncpa [#allocation6], 0 }
   0x2   :  { %9 = vsyncpa [#allocation4], 0  ;;  %s15_s11 = sshll.u32 %s211_s0, 4  ;;  %s182_s12 = smov [#allocation2]   ;;  %s16_s11 = int_to_ptr.hbm [resolvable:$true] %s15_s11 }
   0x3   :  { %s17_s13 = sshll.u32 %s182_s12, 4  ;;  %s25_s16 = sshll.u32 %s212_s1, 4  ;;  %s18_s13 = int_to_ptr.vmem [resolvable:$true] %s17_s13  ;;  %s26_s16 = int_to_ptr.hbm [resolvable:$true] %s25_s16 }
   0x4   :  { %20 = dma.hbm_to_vmem [thread:$0]  %s16_s11, 128, %s18_s13, [#allocation3]  }
   0x5   :  { %s183_s17 = smov [#allocation5]   ;;  %s184_s19 = smov 128  }
   0x6   :  { %s27_s18 = sshll.u32 %s183_s17, 4  ;;  %s185_s20 = smov 8   ;;  %s28_s18 = int_to_ptr.vmem [resolvable:$true] %s27_s18 }
   0x7   :  { %33 = dma.hbm_to_vmem [thread:$0]  %s26_s16, 2048, %s28_s18, [#allocation6], %s184_s19, %s184_s19, %s185_s20  }
   0x8   :  { %176 = dma.done.wait [#allocation3], 128  }
   0x9   :  { %177 = vsyncadd [#allocation3], 4294967168 }
   0xa   :  { %178 = dma.done.wait [#allocation6], 2048  }
   0xb   :  { %179 = vsyncadd [#allocation6], 4294965248  ;;  %v58_v0 = vld [vmem:[#allocation5 + $0x78] sm:$0xff]  ;;  %v57_v1 = vld [vmem:[#allocation5 + $0x70] sm:$0xff]  ;;  %s186_s0 = smov [#allocation7]   ;;  %s88_s23 = sshll.u32 %s213_s2, 4  ;;  %s89_s23 = int_to_ptr.hbm [resolvable:$true] %s88_s23 }
   0xc   :  { %59 = vmatpush.msra.mxu0 %v58_v0  ;;  %v56_v2 = vld [vmem:[#allocation5 + $0x68] sm:$0xff]  ;;  %v55_v3 = vld [vmem:[#allocation5 + $0x60] sm:$0xff]  ;;  %v54_v4 = vld [vmem:[#allocation5 + $0x58] sm:$0xff]  ;;  %s86_s1 = sshll.u32 %s186_s0, 4  ;;  %s87_s1 = int_to_ptr.vmem [resolvable:$true] %s86_s1 }
   0xd   :  { %v53_v5 = vld [vmem:[#allocation5 + $0x50] sm:$0xff]  ;;  %v52_v6 = vld [vmem:[#allocation5 + $0x48] sm:$0xff]  ;;  %v51_v7 = vld [vmem:[#allocation5 + $0x40] sm:$0xff] }
   0xe   :  { %60 = vmatpush.msra.mxu0 %v57_v1  ;;  %v50_v8 = vld [vmem:[#allocation5 + $0x38] sm:$0xff]  ;;  %v49_v9 = vld [vmem:[#allocation5 + $0x30] sm:$0xff]  ;;  %v48_v10 = vld [vmem:[#allocation5 + $0x28] sm:$0xff] }
   0xf   :  { %v47_v11 = vld [vmem:[#allocation5 + $0x20] sm:$0xff]  ;;  %v46_v12 = vld [vmem:[#allocation5 + $0x18] sm:$0xff]  ;;  %v45_v13 = vld [vmem:[#allocation5 + $0x10] sm:$0xff] }
  0x10   :  { %61 = vmatpush.msra.mxu0 %v56_v2  ;;  %v44_v14 = vld [vmem:[#allocation5 + $0x8] sm:$0xff]  ;;  %v43_v15 = vld [vmem:[#allocation5] sm:$0xff]  ;;  %v42_v16 = vld [vmem:[#allocation2] sm:$0xff] }
  0x12   :  { %62 = vmatpush.msra.mxu0 %v55_v3 }
  0x14   :  { %63 = vmatpush.msra.mxu0 %v54_v4 }
  0x16   :  { %64 = vmatpush.msra.mxu0 %v53_v5 }
  0x18   :  { %65 = vmatpush.msra.mxu0 %v52_v6 }
  0x1a   :  { %66 = vmatpush.msra.mxu0 %v51_v7 }
  0x1c   :  { %67 = vmatpush.msra.mxu0 %v50_v8 }
  0x1e   :  { %68 = vmatpush.msra.mxu0 %v49_v9 }
  0x20   :  { %69 = vmatpush.msra.mxu0 %v48_v10 }
  0x22   :  { %70 = vmatpush.msra.mxu0 %v47_v11 }
  0x24   :  { %71 = vmatpush.msra.mxu0 %v46_v12 }
  0x26   :  { %72 = vmatpush.msra.mxu0 %v45_v13 }
  0x28   :  { %73 = vmatpush.msra.mxu0 %v44_v14 }
  0x2a   :  { %74 = vmatpush.msra.mxu0 %v43_v15 }
  0x2b   :  { %75 = vmatmul.f32.vlgmr.msra.gmra.mxu0 %v42_v16 }
  0xa8   :  { %v76_v17 = vpop.f32.mrf.mxu0 }
  0xa9   :  { %v79_v18 = vmul.f32 0.17677669, %v76_v17 }
  0xab   :  { %80 = vst [vmem:[#allocation7] sm:$0xff] %v79_v18 }
  0xac   :  { %91 = dma.vmem_to_hbm [thread:$0]  %s87_s1, 128, %s89_s23, [#allocation4]  }
  0xad   :  { %180 = dma.done.wait [#allocation4], 128  }
  0xae   :  { %181 = vsyncadd [#allocation4], 4294967168 }
  0xaf   :  { %96 = vsyncpa [#allocation3], 1 }
  0xb0   :  { %97 = vsyncpa [#allocation6], 1 }
  0xb1   :  { %98 = vsyncpa [#allocation4], 1 }

</bundles_post_ra>
